<compile_context>
chip_gen: v6e
topology: v6e:2x2x1
jax: 0.10.0
libtpu: 0.0.40
codegen_flags: <defaults>
</compile_context>

<pallas_src>
import functools

import jax
import jax.numpy as jnp
from jax.experimental import pallas as pl
from jax.experimental.pallas import tpu as pltpu


def _group_ln_kernel(x_ref, w_ref, b_ref, o_ref, *, eps):
    # x_ref: (1, 1, Cg, TL)   one (batch, group, L-tile) block
    # w_ref: (1, Cg, 1)       per-channel scale for this group
    # b_ref: (1, Cg, 1)       per-channel bias for this group
    x = x_ref[...].astype(jnp.float32)                     # (1, 1, Cg, TL)
    mu = jnp.mean(x, axis=2, keepdims=True)                # reduce over Cg
    xc = x - mu
    var = jnp.mean(xc * xc, axis=2, keepdims=True)
    inv = jax.lax.rsqrt(var + eps)                         # (1,1,1,TL) -> EUP, cheap
    w = w_ref[...].astype(jnp.float32).reshape(1, 1, -1, 1)
    b = b_ref[...].astype(jnp.float32).reshape(1, 1, -1, 1)
    o_ref[...] = (xc * inv * w + b).astype(o_ref.dtype)


def _pick_tile_l(L, Cg, itemsize, max_tile_l):
    """Largest lane-dense L tile that divides L and keeps the pipelined
    working set (2 in + 2 out buffers) under a ~16 MiB budget (safe for v5e's
    16 MiB scoped default and v7x's 64 MiB physical VMEM)."""
    if L % 128 != 0:
        # Block equals the full L extent -> satisfies the (8,128) rule.
        return L
    budget_bytes = 16 * 1024 * 1024
    cap_units = max(1, budget_bytes // (4 * Cg * itemsize * 128))
    units_total = L // 128
    units = min(units_total, cap_units, max(1, max_tile_l // 128))
    while units_total % units != 0:
        units -= 1
    return units * 128


def group_layer_norm_1d(x, weight, bias, groups=1, eps=1e-6, max_tile_l=2048):
    """Forward pass of GroupLayerNorm1d.

    x:      (N, C, L)
    weight: (C,)
    bias:   (C,)
    returns (N, C, L)
    """
    N, C, L = x.shape
    assert C % groups == 0
    Cg = C // groups

    xg = x.reshape(N, groups, Cg, L)
    wg = weight.reshape(groups, Cg, 1)
    bg = bias.reshape(groups, Cg, 1)

    tl = _pick_tile_l(L, Cg, jnp.dtype(x.dtype).itemsize, max_tile_l)
    assert L % tl == 0
    n_ltiles = L // tl

    itemsize = jnp.dtype(x.dtype).itemsize
    cost = pl.CostEstimate(
        flops=8 * N * C * L,
        transcendentals=N * groups * L,
        bytes_accessed=2 * N * C * L * itemsize + 2 * C * itemsize,
    )

    out = pl.pallas_call(
        functools.partial(_group_ln_kernel, eps=eps),
        out_shape=jax.ShapeDtypeStruct((N, groups, Cg, L), x.dtype),
        # groups outermost so the weight/bias block index only changes
        # `groups` times -> param DMAs are hoisted out of the inner loops.
        grid=(groups, N, n_ltiles),
        in_specs=[
            pl.BlockSpec((1, 1, Cg, tl), lambda g, n, l: (n, g, 0, l)),
            pl.BlockSpec((1, Cg, 1), lambda g, n, l: (g, 0, 0)),
            pl.BlockSpec((1, Cg, 1), lambda g, n, l: (g, 0, 0)),
        ],
        out_specs=pl.BlockSpec((1, 1, Cg, tl), lambda g, n, l: (n, g, 0, l)),
        compiler_params=pltpu.CompilerParams(
            # No reduction grid axis -> everything is parallel (lets the
            # runtime shard across v7x's two TensorCores).
            dimension_semantics=("parallel", "parallel", "parallel"),
            vmem_limit_bytes=32 * 1024 * 1024,
        ),
        cost_estimate=cost,
    )(xg, wg, bg)

    return out.reshape(N, C, L)


def _reference(x, weight, bias, groups, eps):
    N, C, L = x.shape
    Cg = C // groups
    xg = x.reshape(N, groups, Cg, L).astype(jnp.float32)
    mu = jnp.mean(xg, axis=2, keepdims=True)
    var = jnp.mean((xg - mu) ** 2, axis=2, keepdims=True)
    y = (xg - mu) / jnp.sqrt(var + eps)
    y = y.reshape(N, C, L)
    return weight.reshape(1, C, 1) * y + bias.reshape(1, C, 1)


if __name__ == "__main__":
    key = jax.random.PRNGKey(0)
    kx, kw, kb = jax.random.split(key, 3)

    # Test 1: small shape matching the module's typical use (L < 128 path).
    N, C, L = 2, 8, 16
    groups = 2
    eps = 1e-6

    x = jax.random.normal(kx, (N, C, L), dtype=jnp.float32)
    weight = 1.0 + 0.1 * jax.random.normal(kw, (C,), dtype=jnp.float32)
    bias = 0.1 * jax.random.normal(kb, (C,), dtype=jnp.float32)

    out = group_layer_norm_1d(x, weight, bias, groups=groups, eps=eps)
    out = jax.block_until_ready(out)
    ref = _reference(x, weight, bias, groups, eps)
    assert out.shape == (N, C, L)
    assert jnp.allclose(out, ref, atol=1e-5, rtol=1e-5), (
        f"max abs err = {jnp.max(jnp.abs(out - ref))}"
    )

    # Test 2: L a multiple of 128 with a forced small tile so the lane-tiled
    # multi-step grid path (TL < L) is exercised.
    k2x, k2w, k2b = jax.random.split(jax.random.PRNGKey(0), 3)
    N2, C2, L2, g2 = 2, 32, 256, 4
    x2 = jax.random.normal(k2x, (N2, C2, L2), dtype=jnp.float32)
    w2 = 1.0 + 0.1 * jax.random.normal(k2w, (C2,), dtype=jnp.float32)
    b2 = 0.1 * jax.random.normal(k2b, (C2,), dtype=jnp.float32)
    out2 = group_layer_norm_1d(x2, w2, b2, groups=g2, eps=eps, max_tile_l=128)
    out2 = jax.block_until_ready(out2)
    ref2 = _reference(x2, w2, b2, g2, eps)
    assert jnp.allclose(out2, ref2, atol=1e-5, rtol=1e-5), (
        f"max abs err = {jnp.max(jnp.abs(out2 - ref2))}"
    )

    print("KERNEL_OK")
</pallas_src>

<mosaic_0001>
module attributes {stable_mosaic.version = 11 : i64} {
  func.func @_group_ln_kernel(%arg0: i32, %arg1: i32, %arg2: i32, %arg3: memref<1x1x4x16xf32, #tpu.memory_space<vmem>>, %arg4: memref<1x4x1xf32, #tpu.memory_space<vmem>>, %arg5: memref<1x4x1xf32, #tpu.memory_space<vmem>>, %arg6: memref<1x1x4x16xf32, #tpu.memory_space<vmem>>) attributes {dimension_semantics = [#tpu.dimension_semantics<parallel>, #tpu.dimension_semantics<parallel>, #tpu.dimension_semantics<parallel>], iteration_bounds = array<i64: 2, 2, 1>, scalar_prefetch = 0 : i64, scratch_operands = 0 : i64, tpu.core_type = #tpu.core_type<tc>, window_params = [{transform_indices = @transform_0, window_bounds = array<i64: 1, 1, 4, 16>}, {transform_indices = @transform_1, window_bounds = array<i64: 1, 4, 1>}, {transform_indices = @transform_2, window_bounds = array<i64: 1, 4, 1>}, {transform_indices = @transform_3, window_bounds = array<i64: 1, 1, 4, 16>}]} {
    %c0 = arith.constant 0 : index
    %c0_0 = arith.constant 0 : index
    %c0_1 = arith.constant 0 : index
    %c0_2 = arith.constant 0 : index
    %0 = vector.load %arg3[%c0, %c0_0, %c0_1, %c0_2] : memref<1x1x4x16xf32, #tpu.memory_space<vmem>>, vector<1x1x4x16xf32>
    %cst = arith.constant dense<0.000000e+00> : vector<1x1x16xf32>
    %1 = vector.multi_reduction <add>, %0, %cst [2] : vector<1x1x4x16xf32> to vector<1x1x16xf32>
    %2 = vector.shape_cast %1 : vector<1x1x16xf32> to vector<1x1x1x16xf32>
    %cst_3 = arith.constant 4.000000e+00 : f32
    %3 = vector.broadcast %cst_3 : f32 to vector<1x1x1x16xf32>
    %4 = arith.divf %2, %3 : vector<1x1x1x16xf32>
    %5 = vector.broadcast %4 : vector<1x1x1x16xf32> to vector<1x1x4x16xf32>
    %6 = arith.subf %0, %5 : vector<1x1x4x16xf32>
    %7 = arith.mulf %6, %6 : vector<1x1x4x16xf32>
    %cst_4 = arith.constant dense<0.000000e+00> : vector<1x1x16xf32>
    %8 = vector.multi_reduction <add>, %7, %cst_4 [2] : vector<1x1x4x16xf32> to vector<1x1x16xf32>
    %9 = vector.shape_cast %8 : vector<1x1x16xf32> to vector<1x1x1x16xf32>
    %cst_5 = arith.constant 4.000000e+00 : f32
    %10 = vector.broadcast %cst_5 : f32 to vector<1x1x1x16xf32>
    %11 = arith.divf %9, %10 : vector<1x1x1x16xf32>
    %cst_6 = arith.constant 9.99999997E-7 : f32
    %12 = vector.broadcast %cst_6 : f32 to vector<1x1x1x16xf32>
    %13 = arith.addf %11, %12 : vector<1x1x1x16xf32>
    %14 = math.rsqrt %13 : vector<1x1x1x16xf32>
    %c0_7 = arith.constant 0 : index
    %c0_8 = arith.constant 0 : index
    %c0_9 = arith.constant 0 : index
    %15 = vector.load %arg4[%c0_7, %c0_8, %c0_9] : memref<1x4x1xf32, #tpu.memory_space<vmem>>, vector<1x4x1xf32>
    %16 = vector.shape_cast %15 : vector<1x4x1xf32> to vector<1x1x4x1xf32>
    %c0_10 = arith.constant 0 : index
    %c0_11 = arith.constant 0 : index
    %c0_12 = arith.constant 0 : index
    %17 = vector.load %arg5[%c0_10, %c0_11, %c0_12] : memref<1x4x1xf32, #tpu.memory_space<vmem>>, vector<1x4x1xf32>
    %18 = vector.shape_cast %17 : vector<1x4x1xf32> to vector<1x1x4x1xf32>
    %19 = vector.broadcast %14 : vector<1x1x1x16xf32> to vector<1x1x4x16xf32>
    %20 = arith.mulf %6, %19 : vector<1x1x4x16xf32>
    %21 = vector.broadcast %16 : vector<1x1x4x1xf32> to vector<1x1x4x16xf32>
    %22 = arith.mulf %20, %21 : vector<1x1x4x16xf32>
    %23 = vector.broadcast %18 : vector<1x1x4x1xf32> to vector<1x1x4x16xf32>
    %24 = arith.addf %22, %23 : vector<1x1x4x16xf32>
    %c0_13 = arith.constant 0 : index
    %c0_14 = arith.constant 0 : index
    %c0_15 = arith.constant 0 : index
    %c0_16 = arith.constant 0 : index
    %25 = vector.load %arg6[%c0_13, %c0_14, %c0_15, %c0_16] : memref<1x1x4x16xf32, #tpu.memory_space<vmem>>, vector<1x1x4x16xf32>
    tpu.vector_store %arg6[%c0_13, %c0_14, %c0_15, %c0_16], %24 {strides = array<i32>} : memref<1x1x4x16xf32, #tpu.memory_space<vmem>>, vector<1x1x4x16xf32>,
    return
  }
  func.func @transform_0(%arg0: i32, %arg1: i32, %arg2: i32) -> (i32, i32, i32, i32) {
    %c0_i32 = arith.constant 0 : i32
    %c0_i32_0 = arith.constant 0 : i32
    return %arg1, %arg0, %c0_i32, %arg2 : i32, i32, i32, i32
  }
  func.func @transform_1(%arg0: i32, %arg1: i32, %arg2: i32) -> (i32, i32, i32) {
    %c0_i32 = arith.constant 0 : i32
    %c0_i32_0 = arith.constant 0 : i32
    %c0_i32_1 = arith.constant 0 : i32
    return %arg0, %c0_i32, %c0_i32_0 : i32, i32, i32
  }
  func.func @transform_2(%arg0: i32, %arg1: i32, %arg2: i32) -> (i32, i32, i32) {
    %c0_i32 = arith.constant 0 : i32
    %c0_i32_0 = arith.constant 0 : i32
    %c0_i32_1 = arith.constant 0 : i32
    return %arg0, %c0_i32, %c0_i32_0 : i32, i32, i32
  }
  func.func @transform_3(%arg0: i32, %arg1: i32, %arg2: i32) -> (i32, i32, i32, i32) {
    %c0_i32 = arith.constant 0 : i32
    %c0_i32_0 = arith.constant 0 : i32
    return %arg1, %arg0, %c0_i32, %arg2 : i32, i32, i32, i32
  }
}

</mosaic_0001>

<bundles_post_ra>
// kernel: tpu_custom_call.1
= control target key start
LH: loop header
LB: loop body
LE: loop exit
PB: predicated region body
PF: predicated region fallthrough
CT: control target
= control target key end

     0   :  { %8 = vsyncpa [#allocation3], 0  ;;  %s752_s0 = inlined_call_operand.vmem [shape: f32[2,2,4,16], index: 0, kind: input, shape index: {}]   ;;  %s753_s1 = inlined_call_operand.vmem [shape: f32[2,4,1], index: 1, kind: input, shape index: {}]   ;;  %s754_s2 = inlined_call_operand.vmem [shape: f32[2,4,1], index: 2, kind: input, shape index: {}]   ;;  %s755_s3 = inlined_call_operand.hbm [shape: f32[2,2,4,16], index: 3, kind: output, shape index: {}]  }
   0x1   :  { %10 = vsyncpa [#allocation3 + $0x1], 0  ;;  %s619_s12 = smov 0   ;;  %s621_s13 = smov 0  }
   0x2   :  { %s623_s14 = smov 0   ;;  %s625_s15 = smov 0  }
   0x3   :  { %s627_s16 = smov 0   ;;  %s629_s17 = smov 0  }
   0x4   :  { %s631_s18 = smov 0   ;;  %s633_s19 = smov 0  }
   0x5 LB: > { %s413_s20 = sadd.s32 4294967295, %s595_s19   ;;  %s414_s21 = sadd.s32 4294967294, %s595_s19   ;;  %s595_s19 = sphi %s633_s19, %s16_s19   ;;  %s591_s18 = sphi %s631_s18, %s767_s18   ;;  %s587_s17 = sphi %s629_s17, %s766_s17   ;;  %s583_s16 = sphi %s627_s16, %s765_s16   ;;  %s579_s15 = sphi %s625_s15, %s764_s15   ;;  %s575_s14 = sphi %s623_s14, %s763_s14   ;;  %s571_s13 = sphi %s621_s13, %s762_s13   ;;  %s567_s12 = sphi %s619_s12, %s761_s12  }
   0x6   : > { %s31_s22 = sadd.s32 1, %s587_s17  ;;  %s35_s23 = sadd.s32 1, %s591_s18 }
   0x7   : > { %p33_p0 = scmp.ge.s32.totalorder %s31_s22, 2  ;;  %p138_p1 = scmp.ne.s32.totalorder %s575_s14, %s571_s13 }
   0x8   : > { %p139_p2 = scmp.eq.s32.totalorder %s413_s20, 3  ;;  %p144_p5 = scmp.ne.s32.totalorder %s571_s13, %s567_s12 }
   0x9   : > { %s769_s22 = smov (%p33_p0, %s31_s22), 0  ;;  %s771_s23 = smov (!%p33_p0, %s35_s23), %s591_s18 }
   0xa   : > { %s121_s24 = ssub.s32 %s587_s17, %s769_s22  ;;  %p670_p3 = por %p139_p2, %p138_p1 }
   0xb   : > { %p37_p4 = scmp.ge.s32.totalorder %s771_s23, 2  ;;  %p145_p6 = scmp.eq.s32.totalorder %s414_s21, 3 }
   0xc   : > { %p417_p7 = scmp.ge.s32.totalorder %s595_s19, 1  ;;  %p191_p9 = scmp.lt.s32.totalorder %s595_s19, 5 }
   0xd   : > { %s773_s23 = smov (%p37_p4, %s771_s23), 0  ;;  %p679_p8 = por %p145_p6, %p144_p5 }
   0xe   : > { %758 = sst [smem:[#allocation5_spill]] %s773_s23  ;;  %s122_s27 = ssub.s32 %s591_s18, %s773_s23 }
   0xf   : > { %s128_s28 = sadd.s32 1, %s575_s14  ;;  %s123_s29 = sor.u32 %s122_s27, %s121_s24 }
  0x10   : > { %p192_p10 = pnand %p417_p7, %p191_p9  ;;  %p126_p11 = scmp.eq.s32.totalorder %s123_s29, 0 }
  0x11   : > { %p231_p12 = scmp.lt.s32.totalorder (!%p192_p10), %s583_s16, 1  ;;  %p229_p13 = scmp.lt.s32.totalorder (!%p192_p10), %s579_s15, 1 }
  0x12   : > { %s688_s30 = scalar_select %p126_p11, %s575_s14, %s128_s28  }
  0x13   : > { %195 = sbr.rel (%p192_p10) target bundleno = 172 (0xac), region = 32 }
  0x18   : > { %v597_v0 = vmov 0   ;;  %s232_s4 = scalar_select %p231_p12, %s583_s16, 1  ;;  %vm249_vm0 = vcmask 125952  }
  0x19   : > { %500 = vset.pattern.permute.xlu0 %v597_v0  ;;  %s230_s20 = scalar_select %p229_p13, %s579_s15, 1 }
  0x1a   : > { %s421_s5 = sshll.u32 %s232_s4, 2 }
  0x1b   : > { %s243_s8 = scalar_lea.vmem %s753_s1, %s421_s5  ;;  %s247_s11 = scalar_lea.vmem %s754_s2, %s421_s5 }
  0x1c   : > { %v271_v1 = vld [vmem:[%s243_s8] sm:$0xf]  ;;  %s419_s21 = sshll.u32 %s230_s20, 1  ;;  %s424_s5 = sshll.u32 %s579_s15, 1 }
  0x1d   : > { %276 = vperm.xlu0 %500, %v271_v1   ;;  %v272_v2 = vld [vmem:[%s247_s11] sm:$0xf]  ;;  %s237_s24 = sadd.s32 %s419_s21, %s232_s4  ;;  %s300_s6 = sadd.s32 %s583_s16, %s424_s5 }
  0x1e   : > { %s420_s27 = sshll.u32 %s237_s24, 2  ;;  %s425_s7 = sshll.u32 %s300_s6, 6 }
  0x1f   : > { %s239_s23 = scalar_lea.vmem %s752_s0, %s420_s27  ;;  %s302_s20 = scalar_lea.hbm %s755_s3, %s425_s7 }
  0x20   : > { %v248_v3 = vld [vmem:[%s239_s23] sm:$0xf]  ;;  %s226_s23 = sand.u32 1, %s571_s13   ;;  %s598_s15 = smov [#allocation2]  }
  0x21   : > { %282 = vperm.xlu0 %500, %v272_v2   ;;  %v250_v4 = vsel %vm249_vm0, %v248_v3, 0.0  ;;  %s418_s4 = sshll.u32 %s226_s23, 2  ;;  %s288_s21 = scalar_lea.sflag [#allocation3], %s226_s23 }
  0x22   : > { %v251_v5 = vrot.slane %v250_v4, 4  ;;  %s228_s8 = scalar_lea.vmem [#allocation2], %s418_s4  ;;  %s507_s16 = sshll.u32 %s598_s15, 4  ;;  %s508_s16 = int_to_ptr.vmem [resolvable:$false] %s507_s16 }
  0x23   : > { %s304_s9 = sshll.u32 %s228_s8, 4  ;;  %s509_s27 = scalar_lea.vmem %s508_s16, 128  ;;  %s305_s9 = int_to_ptr.vmem [resolvable:$true] %s304_s9 }
  0x24   : > { %v252_v6 = vadd.f32 %v251_v5, %v250_v4  ;;  %s503_s24 = scalar_lea.vmem %s305_s9, 64  ;;  %p510_p4 = scmp.lt.s32.totalorder %s305_s9, %s508_s16 }
  0x25   : > { %p504_p0 = scmp.ne.s32.totalorder %s305_s9, %s503_s24  ;;  %p511_p5 = scmp.lt.s32.totalorder %s509_s27, %s503_s24 }
  0x26   : > { %v253_v7 = vrot.slane %v252_v6, 2 }
  0x27   : > { %p505_p1 = pnand %p504_p0, %p670_p3  ;;  %p512_p6 = por %p511_p5, %p510_p4 }
  0x28   : > { %v254_v8 = vadd.f32 %v253_v7, %v252_v6 }
  0x29   : > { %p506_p2 = pneg %p505_p1 }
  0x2a   : > { %v255_v9 = vrot.slane %v254_v8, 1 }
  0x2b   : > { %p513_p7 = pnand %p512_p6, %p506_p2 }
  0x2c   : > { %v256_v10 = vadd.f32 %v255_v9, %v254_v8 }
  0x2e   : > { %v258_v11 = vmul.f32 0.25, %v256_v10 }
  0x30   : > { %v259_v12 = vsub.f32 %v248_v3, %v258_v11 }
  0x32   : > { %v260_v13 = vmul.f32 %v259_v12, %v259_v12 }
  0x34   : > { %v261_v14 = vsel %vm249_vm0, %v260_v13, 0.0 }
  0x35   : > { %v262_v15 = vrot.slane %v261_v14, 4 }
  0x37   : > { %v263_v16 = vadd.f32 %v262_v15, %v261_v14 }
  0x39   : > { %v264_v17 = vrot.slane %v263_v16, 2 }
  0x3b   : > { %v265_v18 = vadd.f32 %v264_v17, %v263_v16 }
  0x3d   : > { %v266_v19 = vrot.slane %v265_v18, 1 }
  0x3f   : > { %v267_v20 = vadd.f32 %v266_v19, %v265_v18 }
  0x41   : > { %v268_v21 = vmul.f32 0.25, %v267_v20 }
  0x43   : > { %v269_v22 = vadd.f32 1e-06, %v268_v21 }
  0x45   : > { %501 = vrsqrt.f32 %v269_v22 }
  0x52   : > { %v502_v23 = vpop.eup %501 }
  0x53   : > { %v273_v24 = vmul.f32 %v502_v23, %v259_v12 }
  0x98   : > { %v277_v25 = vpop.permute.xlu0 %276 }
  0x99   : > { %v279_v26 = vmul.f32 %v277_v25, %v273_v24 }
  0x9c   : > { %v283_v27 = vpop.permute.xlu0 %282 }
  0x9d   : > { %v285_v28 = vadd.f32 %v283_v27, %v279_v26 }
  0x9f   : > { %286 = vst.msk [vmem:[%s228_s8] sm:$0xf] %vm249_vm0, %v285_v28 }
  0xa0   : > { %516 = shalt.err (!%p513_p7)
}
  0xa1   : > { %s517_s28 = scalar_lea.hbm %s302_s20, 64  ;;  %s521_s4 = scalar_lea.hbm %s755_s3, 256 }
  0xa2   : > { %p518_p9 = scmp.ne.s32.totalorder %s302_s20, %s517_s28  ;;  %p522_p12 = scmp.lt.s32.totalorder %s302_s20, %s755_s3 }
  0xa3   : > { %p523_p13 = scmp.lt.s32.totalorder %s521_s4, %s517_s28 }
  0xa4   : > { %p519_p10 = pnand %p518_p9, %p670_p3 }
  0xa5   : > { %p524_p0 = por %p523_p13, %p522_p12 }
  0xa6   : > { %p520_p11 = pneg %p519_p10 }
  0xa8   : > { %p525_p1 = pnand %p524_p0, %p520_p11 }
  0xaa   : > { %528 = shalt.err (!%p525_p1)
}
  0xab   : > { %428 = dma.vmem_to_hbm [thread:$0]  (%p670_p3), %s305_s9, 64, %s302_s20, %s288_s21  }
  0xac PF: > { %p434_p2 = scmp.ge.s32.totalorder %s595_s19, 2  ;;  %s316_s7 = sand.u32 1, %s567_s12  }
  0xad   : > { %s317_s8 = scalar_lea.sflag [#allocation3], %s316_s7 }
  0xae   : > { %p431_p4 = pnand %p434_p2, %p679_p8 }
  0xb0   : > { %p432_p5 = pneg %p431_p4 }
  0xb2   : > { %562 = dma.done.wait (%p432_p5), %s317_s8, 64  }
  0xb3   : > { %564 = vsyncadd (%p432_p5), %s317_s8, 4294967232  ;;  %s16_s19 = sadd.s32 1, %s595_s19   ;;  %s760_s25 = sld [smem:[#allocation5_spill]] }
  0xb4   : > { %p13_p6 = scmp.ge.s32.totalorder %s16_s19, 6   ;;  %s761_s12 = smov %s571_s13 }
  0xb5   : > { %s762_s13 = smov %s575_s14  ;;  %s763_s14 = smov %s688_s30 }
  0xb6   : > { %s764_s15 = smov %s587_s17  ;;  %s765_s16 = smov %s591_s18 }
  0xb7   : > { %s766_s17 = smov %s769_s22  ;;  %15 = sbr.rel (!%p13_p6) target bundleno = 5 (0x5), region = 73 }
  0xb9   : > { %s767_s18 = smov %s760_s25 }
  0xbc   :  { %322 = vsyncpa [#allocation3], 1 }
  0xbd   :  { %324 = vsyncpa [#allocation3 + $0x1], 1 }

</bundles_post_ra>
